<compile_context>
chip_gen: v7x
topology: tpu7x:2x2x1
jax: 0.10.0
libtpu: 0.0.40
codegen_flags: <defaults>
</compile_context>

<pallas_src>
import jax
import jax.numpy as jnp
from jax.experimental import pallas as pl
from jax.experimental.pallas import tpu as pltpu

_LANES = 128          # vreg lane width; last dim of the 2-D layout
_SUBLANES = 8         # vreg sublane count; row-dim tiling granule
_MIN_GRID_ROWS = 1024 # 512 KiB f32 per block minimum before gridding pays off


def _add_kernel(a_ref, b_ref, o_ref):
    # Whole-tile elementwise add on the VPU.
    o_ref[...] = a_ref[...] + b_ref[...]


def _target_block_bytes():
    """Per-generation VMEM block target for the large-activation path."""
    try:
        kind = jax.devices()[0].device_kind.lower()
    except Exception:
        kind = ""
    if "v7" in kind:
        # 3 arrays x 2 buffers x 4 MiB = 24 MiB < 32 MiB default scoped VMEM.
        return 4 << 20
    # v5e / v6e / unknown: 6 x 2 MiB = 12 MiB, fits v5e's 16 MiB default.
    return 2 << 20


def pallas_add(x538, x523):
    assert x538.shape == x523.shape and x538.dtype == x523.dtype
    orig_shape = x538.shape
    total = x538.size
    dtype = x538.dtype
    itemsize = jnp.dtype(dtype).itemsize

    # Lane-dense flattening: make the last dim exactly 128.
    pad = 0
    if total % _LANES == 0:
        rows = total // _LANES
        a2 = x538.reshape(rows, _LANES)
        b2 = x523.reshape(rows, _LANES)
    else:
        # Pad the flat array up to a multiple of 8*128 so both trailing dims
        # tile cleanly (full lane utilization, unmasked vst), then slice off.
        granule = _SUBLANES * _LANES
        padded = ((total + granule - 1) // granule) * granule
        pad = padded - total
        a2 = jnp.pad(x538.reshape(-1), (0, pad)).reshape(padded // _LANES, _LANES)
        b2 = jnp.pad(x523.reshape(-1), (0, pad)).reshape(padded // _LANES, _LANES)
        rows = padded // _LANES

    cost = pl.CostEstimate(
        flops=int(total),
        bytes_accessed=int(3 * total * itemsize),
        transcendentals=0,
    )

    if rows >= 2 * _MIN_GRID_ROWS:
        # Large-activation path: 1-D parallel grid over rows with big,
        # balanced blocks (>= 2 blocks so both v7x TCs get work).
        max_block_rows = max(_MIN_GRID_ROWS,
                             _target_block_bytes() // (_LANES * itemsize))
        n_blocks = max(2, pl.cdiv(rows, max_block_rows))
        block_rows = pl.cdiv(rows, n_blocks)
        # Round up to the sublane granule so the block shape tiles cleanly.
        block_rows = ((block_rows + _SUBLANES - 1) // _SUBLANES) * _SUBLANES
        grid = (pl.cdiv(rows, block_rows),)
        spec = pl.BlockSpec((block_rows, _LANES), lambda i: (i, 0))
        out2 = pl.pallas_call(
            _add_kernel,
            out_shape=jax.ShapeDtypeStruct(a2.shape, dtype),
            grid=grid,
            in_specs=[spec, spec],
            out_specs=spec,
            compiler_params=pltpu.CompilerParams(
                dimension_semantics=("parallel",),
            ),
            cost_estimate=cost,
        )(a2, b2)
    else:
        # Small case (this module: 98x128 f32 ~ 49 KiB/input): single
        # whole-array VMEM block, no grid, no index_map scaffolding.
        out2 = pl.pallas_call(
            _add_kernel,
            out_shape=jax.ShapeDtypeStruct(a2.shape, dtype),
            in_specs=[
                pl.BlockSpec(memory_space=pltpu.MemorySpace.VMEM),
                pl.BlockSpec(memory_space=pltpu.MemorySpace.VMEM),
            ],
            out_specs=pl.BlockSpec(memory_space=pltpu.MemorySpace.VMEM),
            cost_estimate=cost,
        )(a2, b2)

    if pad:
        return out2.reshape(-1)[:total].reshape(orig_shape)
    return out2.reshape(orig_shape)


if __name__ == "__main__":
    key = jax.random.PRNGKey(0)
    k1, k2, k3, k4 = jax.random.split(key, 4)

    # Shapes implied by the module's forward: [1, 256, 7, 7]
    x538 = jax.random.normal(k1, (1, 256, 7, 7), dtype=jnp.float32)
    x523 = jax.random.normal(k2, (1, 256, 7, 7), dtype=jnp.float32)

    out = pallas_add(x538, x523)
    jax.block_until_ready(out)

    ref = x538 + x523
    assert out.shape == (1, 256, 7, 7)
    assert jnp.allclose(out, ref, atol=1e-6), "mismatch vs reference"

    # Exercise the padded (non-multiple-of-128) fallback path once.
    a_odd = jax.random.normal(k3, (3, 5, 7), dtype=jnp.float32)
    b_odd = jax.random.normal(k4, (3, 5, 7), dtype=jnp.float32)
    out_odd = pallas_add(a_odd, b_odd)
    jax.block_until_ready(out_odd)
    assert out_odd.shape == (3, 5, 7)
    assert jnp.allclose(out_odd, a_odd + b_odd, atol=1e-6), "fallback mismatch"

    print("KERNEL_OK")
</pallas_src>

<mosaic_0001>
module attributes {stable_mosaic.version = 11 : i64} {
  func.func @_add_kernel(%arg0: memref<98x128xf32, #tpu.memory_space<vmem>>, %arg1: memref<98x128xf32, #tpu.memory_space<vmem>>, %arg2: memref<98x128xf32, #tpu.memory_space<vmem>>) attributes {dimension_semantics = [], scalar_prefetch = 0 : i64, scratch_operands = 0 : i64, tpu.core_type = #tpu.core_type<tc>} {
    %c0 = arith.constant 0 : index
    %c0_0 = arith.constant 0 : index
    %0 = vector.load %arg0[%c0, %c0_0] : memref<98x128xf32, #tpu.memory_space<vmem>>, vector<98x128xf32>
    %c0_1 = arith.constant 0 : index
    %c0_2 = arith.constant 0 : index
    %1 = vector.load %arg1[%c0_1, %c0_2] : memref<98x128xf32, #tpu.memory_space<vmem>>, vector<98x128xf32>
    %2 = arith.addf %0, %1 : vector<98x128xf32>
    %c0_3 = arith.constant 0 : index
    %c0_4 = arith.constant 0 : index
    %3 = vector.load %arg2[%c0_3, %c0_4] : memref<98x128xf32, #tpu.memory_space<vmem>>, vector<98x128xf32>
    tpu.vector_store %arg2[%c0_3, %c0_4], %2 {strides = array<i32>} : memref<98x128xf32, #tpu.memory_space<vmem>>, vector<98x128xf32>,
    return
  }
}

</mosaic_0001>

<bundles_post_ra>
// kernel: tpu_custom_call.1
= control target key start
LH: loop header
LB: loop body
LE: loop exit
PB: predicated region body
PF: predicated region fallthrough
CT: control target
= control target key end

     0   :  { %7 = vsyncpa [#allocation3], 0  ;;  %s252_s0 = inlined_call_operand.hbm [shape: f32[98,128], index: 0, kind: input, shape index: {}]   ;;  %s253_s1 = inlined_call_operand.hbm [shape: f32[98,128], index: 1, kind: input, shape index: {}]   ;;  %s254_s2 = inlined_call_operand.hbm [shape: f32[98,128], index: 2, kind: output, shape index: {}]  }
   0x1   :  { %8 = vsyncpa [#allocation6], 0 }
   0x2   :  { %9 = vsyncpa [#allocation4], 0  ;;  %s187_s9 = smov [#allocation2]   ;;  %s115_s13 = scalar_lea.hbm %s252_s0, 1664 }
   0x3   :  { %s15_s10 = sshll.u32 %s187_s9, 4  ;;  %p116_p0 = scmp.ne.s32.totalorder %s252_s0, %s115_s13  ;;  %s16_s10 = int_to_ptr.vmem [resolvable:$true] %s15_s10 }
   0x4   :  { %p119_p1 = scmp.lt.u32.totalorder %s115_s13, %s252_s0 }
   0x6   :  { %p121_p2 = pnand %p119_p1, %p116_p0 }
   0x8   :  { %124 = shalt.err (!%p121_p2)
}
   0x9   :  { %s125_s18 = scalar_lea.vmem %s16_s10, 1664  ;;  %p130_p4 = scmp.lt.s32.totalorder %s16_s10, %s16_s10 }
   0xa   :  { %p126_p3 = scmp.ne.s32.totalorder %s16_s10, %s125_s18  ;;  %p131_p5 = scmp.lt.s32.totalorder %s125_s18, %s125_s18 }
   0xc   :  { %p132_p6 = por %p131_p5, %p130_p4 }
   0xe   :  { %p133_p7 = pnand %p132_p6, %p126_p3 }
  0x10   :  { %136 = shalt.err (!%p133_p7)
}
  0x11   :  { %s188_s19 = smov 128   ;;  %s189_s20 = smov 8  }
  0x12   :  { %21 = dma.hbm_to_vmem [thread:$0]  %s252_s0, 1664, %s16_s10, [#allocation3], %s188_s19, %s188_s19, %s189_s20  }
  0x13   :  { %s190_s23 = smov [#allocation5]   ;;  %s137_s27 = scalar_lea.hbm %s253_s1, 1664 }
  0x14   :  { %s27_s24 = sshll.u32 %s190_s23, 4  ;;  %p138_p8 = scmp.ne.s32.totalorder %s253_s1, %s137_s27  ;;  %s28_s24 = int_to_ptr.vmem [resolvable:$true] %s27_s24 }
  0x15   :  { %p141_p9 = scmp.lt.u32.totalorder %s137_s27, %s253_s1 }
  0x17   :  { %p143_p10 = pnand %p141_p9, %p138_p8 }
  0x19   :  { %146 = shalt.err (!%p143_p10)
}
  0x1a   :  { %s147_s4 = scalar_lea.vmem %s28_s24, 1664  ;;  %p152_p12 = scmp.lt.s32.totalorder %s28_s24, %s28_s24 }
  0x1b   :  { %p148_p11 = scmp.ne.s32.totalorder %s28_s24, %s147_s4  ;;  %p153_p13 = scmp.lt.s32.totalorder %s147_s4, %s147_s4 }
  0x1d   :  { %p154_p0 = por %p153_p13, %p152_p12 }
  0x1f   :  { %p155_p1 = pnand %p154_p0, %p148_p11 }
  0x21   :  { %158 = shalt.err (!%p155_p1)
}
  0x22   :  { %33 = dma.hbm_to_vmem [thread:$0]  %s253_s1, 1664, %s28_s24, [#allocation6], %s188_s19, %s188_s19, %s189_s20  }
  0x23   :  { %181 = dma.done.wait [#allocation3], 1664  }
  0x24   :  { %182 = vsyncadd [#allocation3], 4294965632 }
  0x25   :  { %183 = dma.done.wait [#allocation6], 1664  }
  0x26   :  { %184 = vsyncadd [#allocation6], 4294965632  ;;  %v40_v0 = vld [vmem:[#allocation2] sm:$0xff]  ;;  %v53_v1 = vld [vmem:[#allocation5] sm:$0xff]  ;;  %s191_s1 = smov [#allocation7]  }
  0x27   :  { %v41_v2 = vld [vmem:[#allocation2 + $0x8] sm:$0xff]  ;;  %v66_v3 = vadd.f32 %v53_v1, %v40_v0  ;;  %v54_v4 = vld [vmem:[#allocation5 + $0x8] sm:$0xff]  ;;  %v55_v6 = vld [vmem:[#allocation5 + $0x10] sm:$0xff]  ;;  %s97_s6 = sshll.u32 %s191_s1, 4  ;;  %s98_s6 = int_to_ptr.vmem [resolvable:$true] %s97_s6 }
  0x28   :  { %v42_v5 = vld [vmem:[#allocation2 + $0x10] sm:$0xff]  ;;  %v67_v7 = vadd.f32 %v54_v4, %v41_v2  ;;  %v43_v9 = vld [vmem:[#allocation2 + $0x18] sm:$0xff]  ;;  %v56_v10 = vld [vmem:[#allocation5 + $0x18] sm:$0xff]  ;;  %s159_s7 = scalar_lea.vmem %s98_s6, 1664  ;;  %p164_p3 = scmp.lt.s32.totalorder %s98_s6, %s98_s6 }
  0x29   :  { %v68_v8 = vadd.f32 %v55_v6, %v42_v5  ;;  %v44_v11 = vld [vmem:[#allocation2 + $0x20] sm:$0xff]  ;;  %79 = vst [vmem:[#allocation7] sm:$0xff] %v66_v3  ;;  %v69_v12 = vadd.f32 %v56_v10, %v43_v9  ;;  %v57_v13 = vld [vmem:[#allocation5 + $0x20] sm:$0xff]  ;;  %v58_v15 = vld [vmem:[#allocation5 + $0x28] sm:$0xff]  ;;  %p160_p2 = scmp.ne.s32.totalorder %s98_s6, %s159_s7  ;;  %p165_p4 = scmp.lt.s32.totalorder %s159_s7, %s159_s7 }
  0x2a   :  { %v45_v14 = vld [vmem:[#allocation2 + $0x28] sm:$0xff]  ;;  %80 = vst [vmem:[#allocation7 + $0x8] sm:$0xff] %v67_v7  ;;  %v70_v16 = vadd.f32 %v57_v13, %v44_v11  ;;  %v46_v18 = vld [vmem:[#allocation2 + $0x30] sm:$0xff]  ;;  %v59_v19 = vld [vmem:[#allocation5 + $0x30] sm:$0xff] }
  0x2b   :  { %81 = vst [vmem:[#allocation7 + $0x10] sm:$0xff] %v68_v8  ;;  %v71_v17 = vadd.f32 %v58_v15, %v45_v14  ;;  %v47_v20 = vld [vmem:[#allocation2 + $0x38] sm:$0xff]  ;;  %82 = vst [vmem:[#allocation7 + $0x18] sm:$0xff] %v69_v12  ;;  %v72_v21 = vadd.f32 %v59_v19, %v46_v18  ;;  %v60_v22 = vld [vmem:[#allocation5 + $0x38] sm:$0xff]  ;;  %p166_p5 = por %p165_p4, %p164_p3 }
  0x2c   :  { %v48_v23 = vld [vmem:[#allocation2 + $0x40] sm:$0xff]  ;;  %v61_v24 = vld [vmem:[#allocation5 + $0x40] sm:$0xff]  ;;  %83 = vst [vmem:[#allocation7 + $0x20] sm:$0xff] %v70_v16  ;;  %v73_v25 = vadd.f32 %v60_v22, %v47_v20  ;;  %v62_v28 = vld [vmem:[#allocation5 + $0x48] sm:$0xff] }
  0x2d   :  { %84 = vst [vmem:[#allocation7 + $0x28] sm:$0xff] %v71_v17  ;;  %v74_v26 = vadd.f32 %v61_v24, %v48_v23  ;;  %v49_v27 = vld [vmem:[#allocation2 + $0x48] sm:$0xff]  ;;  %v50_v29 = vld [vmem:[#allocation2 + $0x50] sm:$0xff]  ;;  %85 = vst [vmem:[#allocation7 + $0x30] sm:$0xff] %v72_v21  ;;  %p167_p6 = pnand %p166_p5, %p160_p2 }
  0x2e   :  { %v75_v30 = vadd.f32 %v62_v28, %v49_v27  ;;  %v63_v31 = vld [vmem:[#allocation5 + $0x50] sm:$0xff]  ;;  %v64_v33 = vld [vmem:[#allocation5 + $0x58] sm:$0xff]  ;;  %86 = vst [vmem:[#allocation7 + $0x38] sm:$0xff] %v73_v25  ;;  %v65_v37 = vld [vmem:[#allocation5 + $0x60] sm:$0x3] }
  0x2f   :  { %v51_v32 = vld [vmem:[#allocation2 + $0x58] sm:$0xff]  ;;  %87 = vst [vmem:[#allocation7 + $0x40] sm:$0xff] %v74_v26  ;;  %v76_v34 = vadd.f32 %v63_v31, %v50_v29  ;;  %v52_v36 = vld [vmem:[#allocation2 + $0x60] sm:$0x3] }
  0x30   :  { %v77_v35 = vadd.f32 %v64_v33, %v51_v32  ;;  %88 = vst [vmem:[#allocation7 + $0x48] sm:$0xff] %v75_v30  ;;  %v78_v38 = vadd.f32 %v65_v37, %v52_v36 }
  0x31   :  { %89 = vst [vmem:[#allocation7 + $0x50] sm:$0xff] %v76_v34 }
  0x32   :  { %90 = vst [vmem:[#allocation7 + $0x58] sm:$0xff] %v77_v35  ;;  %91 = vst [vmem:[#allocation7 + $0x60] sm:$0x3] %v78_v38 }
  0x33   :  { %170 = shalt.err (!%p167_p6)
}
  0x34   :  { %s171_s10 = scalar_lea.hbm %s254_s2, 1664 }
  0x35   :  { %p172_p7 = scmp.ne.s32.totalorder %s254_s2, %s171_s10  ;;  %p175_p8 = scmp.lt.u32.totalorder %s171_s10, %s254_s2 }
  0x37   :  { %p177_p9 = pnand %p175_p8, %p172_p7 }
  0x39   :  { %180 = shalt.err (!%p177_p9)
}
  0x3a   :  { %103 = dma.vmem_to_hbm [thread:$0]  %s98_s6, 1664, %s254_s2, [#allocation4], %s188_s19, %s188_s19, %s189_s20  }
  0x3b   :  { %185 = dma.done.wait [#allocation4], 1664  }
  0x3c   :  { %186 = vsyncadd [#allocation4], 4294965632 }
  0x3d   :  { %107 = vsyncpa [#allocation3], 1 }
  0x3e   :  { %108 = vsyncpa [#allocation6], 1 }
  0x3f   :  { %109 = vsyncpa [#allocation4], 1 }

</bundles_post_ra>
